<compile_context>
chip_gen: v6e
topology: v6e:2x2x1
jax: 0.10.0
libtpu: 0.0.40
codegen_flags: <defaults>
</compile_context>

<pallas_src>
import functools

import jax
import jax.numpy as jnp
from jax.experimental import pallas as pl
from jax.experimental.pallas import tpu as pltpu


def _round_up(n: int, m: int) -> int:
    return ((n + m - 1) // m) * m


# --------------------------------------------------------------------------
# Kernel body: one batch tile -> 3 matmuls (MXU, f32 accum) + relu +
# tanh/sigmoid (EUP) + scale, stored in out_ref.dtype.
# --------------------------------------------------------------------------
def _manager_actor_kernel(xg_ref, w1_ref, b1_ref, w2_ref, b2_ref,
                          w3_ref, b3_ref, scale_ref, out_ref,
                          *, absolute_goal: bool):
    mm_dtype = w1_ref.dtype

    # l1(cat([x, g], 1)) — concat already done in the wrapper.
    h = jnp.dot(xg_ref[...], w1_ref[...],
                preferred_element_type=jnp.float32) + b1_ref[...]
    h = jnp.maximum(h, 0.0)                                   # relu (f32)

    h = jnp.dot(h.astype(mm_dtype), w2_ref[...],
                preferred_element_type=jnp.float32) + b2_ref[...]
    h = jnp.maximum(h, 0.0)                                   # relu (f32)

    h = jnp.dot(h.astype(mm_dtype), w3_ref[...],
                preferred_element_type=jnp.float32) + b3_ref[...]

    if absolute_goal:
        # sigmoid(h) == 0.5*(tanh(h/2)+1): exact, single EUP op, no VPU divide.
        act = 0.5 * (jnp.tanh(0.5 * h) + 1.0)
    else:
        act = jnp.tanh(h)                                     # tanh (f32, EUP)

    # scale_ref already has max_action folded in (prepare_params).
    out_ref[...] = (scale_ref[...] * act).astype(out_ref.dtype)


# --------------------------------------------------------------------------
# One-time parameter prep (hoisted out of the per-call path).
# --------------------------------------------------------------------------
def prepare_params(params, *, max_action=1.0, matmul_dtype=jnp.bfloat16):
    """Pad / cast weights once.  Returns (prepared_arrays, meta)."""
    in_dim, hidden = params["w1"].shape
    action_dim = params["w3"].shape[1]

    IN_P = _round_up(in_dim, 32)      # K padded only to 32 (sublane pack), not 128
    H_P = _round_up(hidden, 128)      # 300 -> 384 (review: do NOT go to 512)
    A_P = _round_up(action_dim, 128)  # 4 -> 128

    prep = dict(
        w1=jnp.pad(params["w1"], ((0, IN_P - in_dim), (0, H_P - hidden))).astype(matmul_dtype),
        b1=jnp.pad(params["b1"], ((0, 0), (0, H_P - hidden))).astype(jnp.float32),
        w2=jnp.pad(params["w2"], ((0, H_P - hidden), (0, H_P - hidden))).astype(matmul_dtype),
        b2=jnp.pad(params["b2"], ((0, 0), (0, H_P - hidden))).astype(jnp.float32),
        w3=jnp.pad(params["w3"], ((0, H_P - hidden), (0, A_P - action_dim))).astype(matmul_dtype),
        b3=jnp.pad(params["b3"], ((0, 0), (0, A_P - action_dim))).astype(jnp.float32),
        scale=jnp.pad(params["scale"].astype(jnp.float32) * jnp.float32(max_action),
                      ((0, 0), (0, A_P - action_dim))),
    )
    meta = dict(in_dim=in_dim, hidden=hidden, action_dim=action_dim,
                IN_P=IN_P, H_P=H_P, A_P=A_P,
                matmul_dtype=jnp.dtype(matmul_dtype))
    return prep, meta


# --------------------------------------------------------------------------
# Forward pass (per-call path: concat + activation pad + pallas_call + slice).
# --------------------------------------------------------------------------
def manager_actor_forward(x, g, prep, meta, *, absolute_goal=False):
    B = x.shape[0]
    in_dim = meta["in_dim"]
    hidden = meta["hidden"]
    action_dim = meta["action_dim"]
    IN_P, H_P, A_P = meta["IN_P"], meta["H_P"], meta["A_P"]
    mm_dtype = meta["matmul_dtype"]

    assert x.shape[1] + g.shape[1] == in_dim, "state_dim+goal_dim mismatch with params"

    # Batch tiling: 16-row aligned (bf16 sublane pack).  Tile capped at 1024
    # rows; the cdiv(B,2) keeps >=2 grid steps whenever B allows it so the
    # "parallel" axis can be split across both TensorCores on v7x.
    B16 = _round_up(B, 16)
    TB = min(1024, max(16, _round_up(pl.cdiv(B16, 2), 16)))
    B_P = _round_up(B16, TB)
    grid = (B_P // TB,)

    # Per-call activation prep only (weights were prepared once at init).
    xg = jnp.concatenate([x, g], axis=1)
    xg = jnp.pad(xg, ((0, B_P - B), (0, IN_P - in_dim))).astype(mm_dtype)

    def _batch_map(i):
        return (i, 0)

    def _resident_map(i):
        return (0, 0)

    in_specs = [
        pl.BlockSpec((TB, IN_P), _batch_map),        # xg tile (unpadded-ish K)
        pl.BlockSpec((IN_P, H_P), _resident_map),    # w1 (VMEM-resident)
        pl.BlockSpec((1, H_P), _resident_map),       # b1
        pl.BlockSpec((H_P, H_P), _resident_map),     # w2
        pl.BlockSpec((1, H_P), _resident_map),       # b2
        pl.BlockSpec((H_P, A_P), _resident_map),     # w3
        pl.BlockSpec((1, A_P), _resident_map),       # b3
        pl.BlockSpec((1, A_P), _resident_map),       # scale (max_action folded)
    ]
    out_spec = pl.BlockSpec((TB, A_P), _batch_map)

    # Advisory cost hint computed from TRUE (unpadded) dims.
    itemsize = mm_dtype.itemsize
    w_elems = in_dim * hidden + hidden * hidden + hidden * action_dim
    cost = pl.CostEstimate(
        flops=2 * B * w_elems,
        transcendentals=B * action_dim,
        bytes_accessed=int(B * in_dim * itemsize
                           + w_elems * itemsize
                           + (2 * hidden + 2 * action_dim) * 4
                           + B * action_dim * itemsize))

    kernel = functools.partial(_manager_actor_kernel, absolute_goal=absolute_goal)

    out_padded = pl.pallas_call(
        kernel,
        out_shape=jax.ShapeDtypeStruct((B_P, A_P), mm_dtype),
        grid=grid,
        in_specs=in_specs,
        out_specs=out_spec,
        compiler_params=pltpu.CompilerParams(
            dimension_semantics=("parallel",)),
        cost_estimate=cost,
    )(xg, prep["w1"], prep["b1"], prep["w2"], prep["b2"],
      prep["w3"], prep["b3"], prep["scale"])

    return out_padded[:B, :action_dim].astype(jnp.float32)


# --------------------------------------------------------------------------
# Parameter init + plain-JAX reference.
# --------------------------------------------------------------------------
def init_params(key, state_dim, goal_dim, action_dim, hidden_dim=300):
    """Deterministic synthetic parameter init (PyTorch Linear-style uniform ranges)."""
    keys = jax.random.split(key, 6)

    def lin(kw, kb, fan_in, fan_out):
        bound = 1.0 / jnp.sqrt(fan_in)
        w = jax.random.uniform(kw, (fan_in, fan_out), jnp.float32, -bound, bound)
        b = jax.random.uniform(kb, (1, fan_out), jnp.float32, -bound, bound)
        return w, b

    w1, b1 = lin(keys[0], keys[1], state_dim + goal_dim, hidden_dim)
    w2, b2 = lin(keys[2], keys[3], hidden_dim, hidden_dim)
    w3, b3 = lin(keys[4], keys[5], hidden_dim, action_dim)

    # scale = nn.Parameter(torch.ones(action_dim)) by default (non-trainable).
    scale = jnp.ones((1, action_dim), jnp.float32)

    return dict(w1=w1, b1=b1, w2=w2, b2=b2, w3=w3, b3=b3, scale=scale)


def reference_forward(x, g, params, *, absolute_goal=False, max_action=1.0):
    """Plain-JAX reference for correctness checking."""
    h = jnp.concatenate([x, g], axis=1)
    h = jax.nn.relu(h @ params["w1"] + params["b1"])
    h = jax.nn.relu(h @ params["w2"] + params["b2"])
    h = h @ params["w3"] + params["b3"]
    h = max_action * (jax.nn.sigmoid(h) if absolute_goal else jnp.tanh(h))
    return params["scale"] * h


if __name__ == "__main__":
    B, state_dim, goal_dim, action_dim = 8, 16, 8, 4

    key = jax.random.PRNGKey(0)
    k_x, k_g, k_p = jax.random.split(key, 3)

    x = jax.random.normal(k_x, (B, state_dim), jnp.float32)
    g = jax.random.normal(k_g, (B, goal_dim), jnp.float32)
    params = init_params(k_p, state_dim, goal_dim, action_dim)
    # Non-trivial scale to exercise the scale * actor(...) path.
    params["scale"] = jnp.array([[1.0, 2.0, 0.5, 1.5]], jnp.float32)

    ref_tanh = reference_forward(x, g, params, absolute_goal=False)
    ref_sig = reference_forward(x, g, params, absolute_goal=True)

    # 1) Exact-path check (f32 matmul operands, f32 store) — validates padding /
    #    concat / scale-fold wiring against the reference math.
    prep32, meta32 = prepare_params(params, matmul_dtype=jnp.float32)
    out_f32 = jax.block_until_ready(
        manager_actor_forward(x, g, prep32, meta32, absolute_goal=False))
    assert out_f32.shape == (B, action_dim)
    assert jnp.allclose(out_f32, ref_tanh, atol=1e-4, rtol=1e-4), "f32 path mismatch"

    # 2) Fast path: bf16 MXU operands + bf16 store, f32 accumulation & elementwise.
    prep_bf, meta_bf = prepare_params(params)   # bf16 default, prepared ONCE
    out_bf16 = jax.block_until_ready(
        manager_actor_forward(x, g, prep_bf, meta_bf, absolute_goal=False))
    assert jnp.allclose(out_bf16, ref_tanh, atol=5e-2, rtol=5e-2), "bf16 tanh path mismatch"

    # 3) absolute_goal=True (sigmoid) branch, reusing the same prepared params.
    out_sig = jax.block_until_ready(
        manager_actor_forward(x, g, prep_bf, meta_bf, absolute_goal=True))
    assert jnp.allclose(out_sig, ref_sig, atol=5e-2, rtol=5e-2), "sigmoid path mismatch"

    print("KERNEL_OK")
</pallas_src>

<mosaic_0001>
module attributes {stable_mosaic.version = 11 : i64} {
  func.func @_manager_actor_kernel(%arg0: i32, %arg1: memref<16x32xf32, #tpu.memory_space<vmem>>, %arg2: memref<32x384xf32, #tpu.memory_space<vmem>>, %arg3: memref<1x384xf32, #tpu.memory_space<vmem>>, %arg4: memref<384x384xf32, #tpu.memory_space<vmem>>, %arg5: memref<1x384xf32, #tpu.memory_space<vmem>>, %arg6: memref<384x128xf32, #tpu.memory_space<vmem>>, %arg7: memref<1x128xf32, #tpu.memory_space<vmem>>, %arg8: memref<1x128xf32, #tpu.memory_space<vmem>>, %arg9: memref<16x128xf32, #tpu.memory_space<vmem>>) attributes {dimension_semantics = [#tpu.dimension_semantics<parallel>], iteration_bounds = array<i64: 1>, scalar_prefetch = 0 : i64, scratch_operands = 0 : i64, tpu.core_type = #tpu.core_type<tc>, window_params = [{transform_indices = @transform_0, window_bounds = array<i64: 16, 32>}, {pipeline_mode = #tpu.pipeline_mode<synchronous>, transform_indices = @transform_1, window_bounds = array<i64: 32, 384>}, {pipeline_mode = #tpu.pipeline_mode<synchronous>, transform_indices = @transform_2, window_bounds = array<i64: 1, 384>}, {pipeline_mode = #tpu.pipeline_mode<synchronous>, transform_indices = @transform_3, window_bounds = array<i64: 384, 384>}, {pipeline_mode = #tpu.pipeline_mode<synchronous>, transform_indices = @transform_4, window_bounds = array<i64: 1, 384>}, {pipeline_mode = #tpu.pipeline_mode<synchronous>, transform_indices = @transform_5, window_bounds = array<i64: 384, 128>}, {pipeline_mode = #tpu.pipeline_mode<synchronous>, transform_indices = @transform_6, window_bounds = array<i64: 1, 128>}, {pipeline_mode = #tpu.pipeline_mode<synchronous>, transform_indices = @transform_7, window_bounds = array<i64: 1, 128>}, {transform_indices = @transform_8, window_bounds = array<i64: 16, 128>}]} {
    %c0 = arith.constant 0 : index
    %c0_0 = arith.constant 0 : index
    %0 = vector.load %arg1[%c0, %c0_0] : memref<16x32xf32, #tpu.memory_space<vmem>>, vector<16x32xf32>
    %c0_1 = arith.constant 0 : index
    %c0_2 = arith.constant 0 : index
    %1 = vector.load %arg2[%c0_1, %c0_2] : memref<32x384xf32, #tpu.memory_space<vmem>>, vector<32x384xf32>
    %cst = arith.constant dense<0.000000e+00> : vector<16x384xf32>
    %2 = tpu.matmul %0, %1, %cst {dimension_numbers = #tpu.dot_dimension_numbers<[1], [0], [0], [1], [0, 0, 1, 1], [], []>} : vector<16x32xf32>, vector<32x384xf32>, vector<16x384xf32> -> vector<16x384xf32>
    %c0_3 = arith.constant 0 : index
    %c0_4 = arith.constant 0 : index
    %3 = vector.load %arg3[%c0_3, %c0_4] : memref<1x384xf32, #tpu.memory_space<vmem>>, vector<1x384xf32>
    %4 = vector.broadcast %3 : vector<1x384xf32> to vector<16x384xf32>
    %5 = arith.addf %2, %4 : vector<16x384xf32>
    %cst_5 = arith.constant 0.000000e+00 : f32
    %6 = vector.broadcast %cst_5 : f32 to vector<16x384xf32>
    %7 = arith.maximumf %5, %6 : vector<16x384xf32>
    %c0_6 = arith.constant 0 : index
    %c0_7 = arith.constant 0 : index
    %8 = vector.load %arg4[%c0_6, %c0_7] : memref<384x384xf32, #tpu.memory_space<vmem>>, vector<384x384xf32>
    %cst_8 = arith.constant dense<0.000000e+00> : vector<16x384xf32>
    %9 = tpu.matmul %7, %8, %cst_8 {dimension_numbers = #tpu.dot_dimension_numbers<[1], [0], [0], [1], [0, 0, 1, 1], [], []>} : vector<16x384xf32>, vector<384x384xf32>, vector<16x384xf32> -> vector<16x384xf32>
    %c0_9 = arith.constant 0 : index
    %c0_10 = arith.constant 0 : index
    %10 = vector.load %arg5[%c0_9, %c0_10] : memref<1x384xf32, #tpu.memory_space<vmem>>, vector<1x384xf32>
    %11 = vector.broadcast %10 : vector<1x384xf32> to vector<16x384xf32>
    %12 = arith.addf %9, %11 : vector<16x384xf32>
    %cst_11 = arith.constant 0.000000e+00 : f32
    %13 = vector.broadcast %cst_11 : f32 to vector<16x384xf32>
    %14 = arith.maximumf %12, %13 : vector<16x384xf32>
    %c0_12 = arith.constant 0 : index
    %c0_13 = arith.constant 0 : index
    %15 = vector.load %arg6[%c0_12, %c0_13] : memref<384x128xf32, #tpu.memory_space<vmem>>, vector<384x128xf32>
    %cst_14 = arith.constant dense<0.000000e+00> : vector<16x128xf32>
    %16 = tpu.matmul %14, %15, %cst_14 {dimension_numbers = #tpu.dot_dimension_numbers<[1], [0], [0], [1], [0, 0, 1, 1], [], []>} : vector<16x384xf32>, vector<384x128xf32>, vector<16x128xf32> -> vector<16x128xf32>
    %c0_15 = arith.constant 0 : index
    %c0_16 = arith.constant 0 : index
    %17 = vector.load %arg7[%c0_15, %c0_16] : memref<1x128xf32, #tpu.memory_space<vmem>>, vector<1x128xf32>
    %18 = vector.broadcast %17 : vector<1x128xf32> to vector<16x128xf32>
    %19 = arith.addf %16, %18 : vector<16x128xf32>
    %20 = math.tanh %19 : vector<16x128xf32>
    %c0_17 = arith.constant 0 : index
    %c0_18 = arith.constant 0 : index
    %21 = vector.load %arg8[%c0_17, %c0_18] : memref<1x128xf32, #tpu.memory_space<vmem>>, vector<1x128xf32>
    %22 = vector.broadcast %21 : vector<1x128xf32> to vector<16x128xf32>
    %23 = arith.mulf %22, %20 : vector<16x128xf32>
    %c0_19 = arith.constant 0 : index
    %c0_20 = arith.constant 0 : index
    %24 = vector.load %arg9[%c0_19, %c0_20] : memref<16x128xf32, #tpu.memory_space<vmem>>, vector<16x128xf32>
    tpu.vector_store %arg9[%c0_19, %c0_20], %23 {strides = array<i32>} : memref<16x128xf32, #tpu.memory_space<vmem>>, vector<16x128xf32>,
    return
  }
  func.func @transform_0(%arg0: i32) -> (i32, i32) {
    %c0_i32 = arith.constant 0 : i32
    %c0_i32_0 = arith.constant 0 : i32
    return %arg0, %c0_i32 : i32, i32
  }
  func.func @transform_1(%arg0: i32) -> (i32, i32) {
    %c0_i32 = arith.constant 0 : i32
    %c0_i32_0 = arith.constant 0 : i32
    %c0_i32_1 = arith.constant 0 : i32
    return %c0_i32, %c0_i32_0 : i32, i32
  }
  func.func @transform_2(%arg0: i32) -> (i32, i32) {
    %c0_i32 = arith.constant 0 : i32
    %c0_i32_0 = arith.constant 0 : i32
    %c0_i32_1 = arith.constant 0 : i32
    return %c0_i32, %c0_i32_0 : i32, i32
  }
  func.func @transform_3(%arg0: i32) -> (i32, i32) {
    %c0_i32 = arith.constant 0 : i32
    %c0_i32_0 = arith.constant 0 : i32
    %c0_i32_1 = arith.constant 0 : i32
    return %c0_i32, %c0_i32_0 : i32, i32
  }
  func.func @transform_4(%arg0: i32) -> (i32, i32) {
    %c0_i32 = arith.constant 0 : i32
    %c0_i32_0 = arith.constant 0 : i32
    %c0_i32_1 = arith.constant 0 : i32
    return %c0_i32, %c0_i32_0 : i32, i32
  }
  func.func @transform_5(%arg0: i32) -> (i32, i32) {
    %c0_i32 = arith.constant 0 : i32
    %c0_i32_0 = arith.constant 0 : i32
    %c0_i32_1 = arith.constant 0 : i32
    return %c0_i32, %c0_i32_0 : i32, i32
  }
  func.func @transform_6(%arg0: i32) -> (i32, i32) {
    %c0_i32 = arith.constant 0 : i32
    %c0_i32_0 = arith.constant 0 : i32
    %c0_i32_1 = arith.constant 0 : i32
    return %c0_i32, %c0_i32_0 : i32, i32
  }
  func.func @transform_7(%arg0: i32) -> (i32, i32) {
    %c0_i32 = arith.constant 0 : i32
    %c0_i32_0 = arith.constant 0 : i32
    %c0_i32_1 = arith.constant 0 : i32
    return %c0_i32, %c0_i32_0 : i32, i32
  }
  func.func @transform_8(%arg0: i32) -> (i32, i32) {
    %c0_i32 = arith.constant 0 : i32
    %c0_i32_0 = arith.constant 0 : i32
    return %arg0, %c0_i32 : i32, i32
  }
}

</mosaic_0001>

<bundles_post_ra>
// kernel: tpu_custom_call.1
= control target key start
LH: loop header
LB: loop body
LE: loop exit
PB: predicated region body
PF: predicated region fallthrough
CT: control target
= control target key end

     0   :  { %13 = vsyncpa [#allocation3], 0  ;;  %s1466_s0 = inlined_call_operand.hbm [shape: f32[16,32], index: 0, kind: input, shape index: {}]   ;;  %s1467_s1 = inlined_call_operand.hbm [shape: f32[32,384], index: 1, kind: input, shape index: {}]   ;;  %s1468_s2 = inlined_call_operand.vmem [shape: f32[1,384], index: 2, kind: input, shape index: {}]   ;;  %s1469_s3 = inlined_call_operand.hbm [shape: f32[384,384], index: 3, kind: input, shape index: {}]   ;;  %s1470_s4 = inlined_call_operand.vmem [shape: f32[1,384], index: 4, kind: input, shape index: {}]   ;;  %s1471_s5 = inlined_call_operand.hbm [shape: f32[384,128], index: 5, kind: input, shape index: {}]   ;;  %s1472_s6 = inlined_call_operand.vmem [shape: f32[1,128], index: 6, kind: input, shape index: {}]   ;;  %s1473_s7 = inlined_call_operand.vmem [shape: f32[1,128], index: 7, kind: input, shape index: {}]   ;;  %s1474_s8 = inlined_call_operand.hbm [shape: f32[16,128], index: 8, kind: output, shape index: {}]  }
   0x1   :  { %14 = vsyncpa [#allocation6], 0 }
   0x2   :  { %15 = vsyncpa [#allocation9], 0 }
   0x3   :  { %16 = vsyncpa [#allocation4], 0  ;;  %s1316_s27 = smov [#allocation5]  }
   0x4   :  { %s34_s28 = sshll.u32 %s1316_s27, 4  ;;  %s35_s28 = int_to_ptr.vmem [resolvable:$true] %s34_s28 }
   0x5   :  { %s1216_s29 = scalar_lea.vmem %s35_s28, 1536  ;;  %p1221_p1 = scmp.lt.s32.totalorder %s35_s28, %s35_s28 }
   0x6   :  { %p1217_p0 = scmp.ne.s32.totalorder %s35_s28, %s1216_s29  ;;  %p1222_p2 = scmp.lt.s32.totalorder %s1216_s29, %s1216_s29 }
   0x8   :  { %p1223_p3 = por %p1222_p2, %p1221_p1 }
   0xa   :  { %p1224_p4 = pnand %p1223_p3, %p1217_p0 }
   0xc   :  { %1227 = shalt.err (!%p1224_p4)
}
   0xd   :  { %s1317_s30 = smov 384   ;;  %s1318_s9 = smov 24  }
   0xe   :  { %40 = dma.hbm_to_vmem [thread:$0]  %s1467_s1, 1536, %s35_s28, [#allocation6], %s1317_s30, %s1317_s30, %s1318_s9  }
   0xf   :  { %s1319_s12 = smov [#allocation2]  }
  0x10   :  { %s22_s13 = sshll.u32 %s1319_s12, 4  ;;  %s23_s13 = int_to_ptr.vmem [resolvable:$true] %s22_s13 }
  0x11   :  { %s1236_s14 = scalar_lea.vmem %s23_s13, 256  ;;  %p1241_p6 = scmp.lt.s32.totalorder %s23_s13, %s23_s13 }
  0x12   :  { %p1237_p5 = scmp.ne.s32.totalorder %s23_s13, %s1236_s14  ;;  %p1242_p7 = scmp.lt.s32.totalorder %s1236_s14, %s1236_s14 }
  0x14   :  { %p1243_p8 = por %p1242_p7, %p1241_p6 }
  0x16   :  { %p1244_p9 = pnand %p1243_p8, %p1237_p5 }
  0x18   :  { %1247 = shalt.err (!%p1244_p9)
}
  0x19   :  { %s1320_s15 = smov 128   ;;  %s1321_s16 = smov 8  }
  0x1a   :  { %28 = dma.hbm_to_vmem [thread:$0]  %s1466_s0, 256, %s23_s13, [#allocation3], %s1320_s15, %s1320_s15, %s1321_s16  }
  0x1b   :  { %s1322_s1 = smov [#allocation7]   ;;  %s1323_s20 = smov [#allocation8]  }
  0x1c   :  { %s48_s19 = sshll.u32 %s1322_s1, 4  ;;  %s62_s21 = sshll.u32 %s1323_s20, 4  ;;  %s49_s19 = int_to_ptr.vmem [resolvable:$true] %s48_s19  ;;  %s63_s21 = int_to_ptr.vmem [resolvable:$true] %s62_s21 }
  0x1d   :  { %s1256_s22 = scalar_lea.vmem %s49_s19, 18432  ;;  %p1261_p11 = scmp.lt.s32.totalorder %s49_s19, %s49_s19 }
  0x1e   :  { %p1257_p10 = scmp.ne.s32.totalorder %s49_s19, %s1256_s22  ;;  %p1262_p12 = scmp.lt.s32.totalorder %s1256_s22, %s1256_s22 }
  0x20   :  { %p1263_p13 = por %p1262_p12, %p1261_p11 }
  0x22   :  { %p1264_p0 = pnand %p1263_p13, %p1257_p10 }
  0x24   :  { %1267 = shalt.err (!%p1264_p0)
}
  0x25   :  { %54 = dma.hbm_to_vmem [thread:$0]  %s1469_s3, 18432, %s49_s19, [#allocation6], %s1317_s30, %s1317_s30, %s1318_s9  }
  0x26   :  { %s1276_s0 = scalar_lea.vmem %s63_s21, 6144  ;;  %p1281_p2 = scmp.lt.s32.totalorder %s63_s21, %s63_s21 }
  0x27   :  { %p1277_p1 = scmp.ne.s32.totalorder %s63_s21, %s1276_s0  ;;  %p1282_p3 = scmp.lt.s32.totalorder %s1276_s0, %s1276_s0 }
  0x29   :  { %p1283_p4 = por %p1282_p3, %p1281_p2 }
  0x2b   :  { %p1284_p5 = pnand %p1283_p4, %p1277_p1 }
  0x2d   :  { %1287 = shalt.err (!%p1284_p5)
}
  0x2e   :  { %68 = dma.hbm_to_vmem [thread:$0]  %s1471_s5, 6144, %s63_s21, [#allocation9], %s1320_s15, %s1320_s15, %s1321_s16  }
  0x2f   :  { %1308 = dma.done.wait [#allocation3], 256  }
  0x30   :  { %1309 = vsyncadd [#allocation3], 4294967040 }
  0x31   :  { %1310 = dma.done.wait [#allocation6], 19968  }
  0x32   :  { %1311 = vsyncadd [#allocation6], 4294947328 }
  0x33   :  { %1312 = dma.done.wait [#allocation9], 6144  }
  0x34   :  { %1313 = vsyncadd [#allocation9], 4294961152  ;;  %v1324_v0 = vmov 0.0   ;;  %v97_v1 = vld [vmem:[#allocation5 + $0x50] sm:$0xff]  ;;  %v96_v2 = vld [vmem:[#allocation5 + $0x48] sm:$0xff]  ;;  %vm116_vm0 = vcmask 261120  }
  0x35   :  { %187 = vmatprep.mubr.f32.mxu1 %v1324_v0  ;;  %v94_v3 = vld [vmem:[#allocation5 + $0x38] sm:$0xff]  ;;  %147 = vmatprep.subr.mxu1 %v97_v1  ;;  %v93_v4 = vld [vmem:[#allocation5 + $0x30] sm:$0xff]  ;;  %v91_v5 = vld [vmem:[#allocation5 + $0x20] sm:$0xff]  ;;  %s1325_s9 = smov [#allocation10]  }
  0x36   :  { %148 = vmatpush1.msra.mxu1 %v96_v2  ;;  %v90_v6 = vld [vmem:[#allocation5 + $0x18] sm:$0xff]  ;;  %v88_v7 = vld [vmem:[#allocation5 + $0x8] sm:$0xff]  ;;  %v87_v8 = vld [vmem:[#allocation5] sm:$0xff]  ;;  %s975_s10 = sshll.u32 %s1325_s9, 4  ;;  %s976_s10 = int_to_ptr.vmem [resolvable:$true] %s975_s10 }
  0x37   :  { %149 = vmatprep.subr.mxu1 %v94_v3  ;;  %v327_v9 = vld [vmem:[#allocation7 + $0x170] sm:$0xff]  ;;  %v326_v10 = vld [vmem:[#allocation7 + $0x168] sm:$0xff]  ;;  %v324_v11 = vld [vmem:[#allocation7 + $0x158] sm:$0xff]  ;;  %p1293_p7 = scmp.lt.s32.totalorder %s976_s10, %s976_s10 }
  0x38   :  { %150 = vmatpush1.msra.mxu1 %v93_v4  ;;  %442 = vmatprep.subr.mxu0 %v327_v9  ;;  %v323_v12 = vld [vmem:[#allocation7 + $0x150] sm:$0xff]  ;;  %v98_v14 = vld [vmem:[#allocation5 + $0x58] sm:$0xff]  ;;  %v95_v15 = vld [vmem:[#allocation5 + $0x40] sm:$0xff] }
  0x39   :  { %151 = vmatprep.subr.mxu1 %v91_v5  ;;  %v85_v13 = vld [vmem:[#allocation2] sm:$0xff]  ;;  %443 = vmatpush1.msra.mxu0 %v326_v10  ;;  %v321_v16 = vld [vmem:[#allocation7 + $0x140] sm:$0xff]  ;;  %v320_v17 = vld [vmem:[#allocation7 + $0x138] sm:$0xff] }
  0x3a   :  { %152 = vmatpush1.msra.mxu1 %v90_v6  ;;  %444 = vmatprep.subr.mxu0 %v324_v11  ;;  %v86_v18 = vld [vmem:[#allocation2 + $0x8] sm:$0xff]  ;;  %v92_v19 = vld [vmem:[#allocation5 + $0x28] sm:$0xff]  ;;  %v89_v20 = vld [vmem:[#allocation5 + $0x10] sm:$0xff] }
  0x3b   :  { %153 = vmatprep.subr.mxu1 %v88_v7  ;;  %445 = vmatpush1.msra.mxu0 %v323_v12  ;;  %v318_v21 = vld [vmem:[#allocation7 + $0x128] sm:$0xff]  ;;  %v317_v22 = vld [vmem:[#allocation7 + $0x120] sm:$0xff]  ;;  %v315_v23 = vld [vmem:[#allocation7 + $0x110] sm:$0xff] }
  0x3c   :  { %154 = vmatpush1.msra.mxu1 %v87_v8  ;;  %446 = vmatprep.subr.mxu0 %v321_v16  ;;  %v314_v24 = vld [vmem:[#allocation7 + $0x108] sm:$0xff]  ;;  %v312_v25 = vld [vmem:[#allocation7 + $0xf8] sm:$0xff]  ;;  %v311_v26 = vld [vmem:[#allocation7 + $0xf0] sm:$0xff] }
  0x3d   :  { %989 = vmatmul.mubr.msk.f32.vlgmr.msra.gmra.mxu1 %vm116_vm0, %v85_v13  ;;  %1113 = vmatprep.subr.mxu1 %v98_v14  ;;  %v309_v27 = vld [vmem:[#allocation7 + $0xe0] sm:$0xff]  ;;  %v423_v28 = vld [vmem:[#allocation7 + $0x470] sm:$0xff]  ;;  %v422_v29 = vld [vmem:[#allocation7 + $0x468] sm:$0xff] }
  0x3e   :  { %1114 = vmatpush3.msra.mxu1 %v98_v14  ;;  %193 = vmatprep.mubr.f32.mxu1 %v1324_v0  ;;  %v308_v30 = vld [vmem:[#allocation7 + $0xd8] sm:$0xff]  ;;  %v306_v32 = vld [vmem:[#allocation7 + $0xc8] sm:$0xff]  ;;  %v419_v33 = vld [vmem:[#allocation7 + $0x450] sm:$0xff] }
  0x3f   :  { %1115 = vmatprep.subr.mxu1 %v95_v15  ;;  %447 = vmatpush1.msra.mxu0 %v320_v17  ;;  %v420_v31 = vld [vmem:[#allocation7 + $0x458] sm:$0xff]  ;;  %v417_v34 = vld [vmem:[#allocation7 + $0x440] sm:$0xff]  ;;  %v303_v37 = vld [vmem:[#allocation7 + $0xb0] sm:$0xff] }
  0x40   :  { %1116 = vmatpush3.msra.mxu1 %v95_v15  ;;  %448 = vmatprep.subr.mxu0 %v318_v21  ;;  %v305_v35 = vld [vmem:[#allocation7 + $0xc0] sm:$0xff]  ;;  %v416_v36 = vld [vmem:[#allocation7 + $0x438] sm:$0xff]  ;;  %v414_v38 = vld [vmem:[#allocation7 + $0x428] sm:$0xff] }
  0x41   :  { %990 = vmatmul.mubr.msk.f32.gmra.mxu1 %vm116_vm0, %v86_v18  ;;  %1117 = vmatprep.subr.mxu1 %v92_v19  ;;  %v302_v39 = vld [vmem:[#allocation7 + $0xa8] sm:$0xff]  ;;  %v413_v40 = vld [vmem:[#allocation7 + $0x420] sm:$0xff]  ;;  %v300_v41 = vld [vmem:[#allocation7 + $0x98] sm:$0xff] }
  0x42   :  { %1118 = vmatpush3.msra.mxu1 %v92_v19  ;;  %1121 = vmatprep.mubr.msk.f32.mxu1 %vm116_vm0, %v85_v13  ;;  %v411_v42 = vld [vmem:[#allocation7 + $0x410] sm:$0xff]  ;;  %v410_v44 = vld [vmem:[#allocation7 + $0x408] sm:$0xff]  ;;  %v297_v45 = vld [vmem:[#allocation7 + $0x80] sm:$0xff] }
  0x43   :  { %1119 = vmatprep.subr.mxu1 %v89_v20  ;;  %449 = vmatpush1.msra.mxu0 %v317_v22  ;;  %v299_v43 = vld [vmem:[#allocation7 + $0x90] sm:$0xff]  ;;  %v408_v46 = vld [vmem:[#allocation7 + $0x3f8] sm:$0xff]  ;;  %v294_v49 = vld [vmem:[#allocation7 + $0x68] sm:$0xff] }
  0x44   :  { %1120 = vmatpush3.msra.mxu1 %v89_v20  ;;  %450 = vmatprep.subr.mxu0 %v315_v23  ;;  %v296_v47 = vld [vmem:[#allocation7 + $0x78] sm:$0xff]  ;;  %v407_v48 = vld [vmem:[#allocation7 + $0x3f0] sm:$0xff]  ;;  %v405_v50 = vld [vmem:[#allocation7 + $0x3e0] sm:$0xff] }
  0x45   :  { %1122 = vmatmul.mubr.msk.f32.vlgmr.msra.gmra.mxu1 %vm116_vm0, %v86_v18  ;;  %451 = vmatpush1.msra.mxu0 %v314_v24  ;;  %v293_v51 = vld [vmem:[#allocation7 + $0x60] sm:$0xff]  ;;  %v404_v52 = vld [vmem:[#allocation7 + $0x3d8] sm:$0xff]  ;;  %v291_v53 = vld [vmem:[#allocation7 + $0x50] sm:$0xff] }
  0x46   :  { %583 = vmatprep.mubr.f32.mxu1 %v1324_v0  ;;  %452 = vmatprep.subr.mxu0 %v312_v25  ;;  %v402_v54 = vld [vmem:[#allocation7 + $0x3c8] sm:$0xff]  ;;  %v401_v56 = vld [vmem:[#allocation7 + $0x3c0] sm:$0xff]  ;;  %v288_v57 = vld [vmem:[#allocation7 + $0x38] sm:$0xff] }
  0x47   :  { %519 = vmatprep.subr.mxu1 %v423_v28  ;;  %453 = vmatpush1.msra.mxu0 %v311_v26  ;;  %v290_v55 = vld [vmem:[#allocation7 + $0x48] sm:$0xff]  ;;  %v399_v58 = vld [vmem:[#allocation7 + $0x3b0] sm:$0xff]  ;;  %v285_v61 = vld [vmem:[#allocation7 + $0x20] sm:$0xff] }
  0x48   :  { %520 = vmatpush1.msra.mxu1 %v422_v29  ;;  %454 = vmatprep.subr.mxu0 %v309_v27  ;;  %v287_v59 = vld [vmem:[#allocation7 + $0x30] sm:$0xff]  ;;  %v398_v60 = vld [vmem:[#allocation7 + $0x3a8] sm:$0xff]  ;;  %v284_v62 = vld [vmem:[#allocation7 + $0x18] sm:$0xff] }
  0x49   :  { %521 = vmatprep.subr.mxu1 %v420_v31  ;;  %455 = vmatpush1.msra.mxu0 %v308_v30  ;;  %v282_v63 = vld [vmem:[#allocation7 + $0x8] sm:$0xff]  ;;  %v281_v1 = vld [vmem:[#allocation7] sm:$0xff]  ;;  %v375_v2 = vld [vmem:[#allocation7 + $0x2f0] sm:$0xff] }
  0x4a   :  { %522 = vmatpush1.msra.mxu1 %v419_v33  ;;  %456 = vmatprep.subr.mxu0 %v306_v32  ;;  %v374_v3 = vld [vmem:[#allocation7 + $0x2e8] sm:$0xff]  ;;  %v372_v4 = vld [vmem:[#allocation7 + $0x2d8] sm:$0xff]  ;;  %v371_v5 = vld [vmem:[#allocation7 + $0x2d0] sm:$0xff] }
  0x4b   :  { %523 = vmatprep.subr.mxu1 %v417_v34  ;;  %457 = vmatpush1.msra.mxu0 %v305_v35  ;;  %v369_v6 = vld [vmem:[#allocation7 + $0x2c0] sm:$0xff]  ;;  %v368_v7 = vld [vmem:[#allocation7 + $0x2b8] sm:$0xff]  ;;  %v366_v8 = vld [vmem:[#allocation7 + $0x2a8] sm:$0xff] }
  0x4c   :  { %524 = vmatpush1.msra.mxu1 %v416_v36  ;;  %458 = vmatprep.subr.mxu0 %v303_v37  ;;  %v365_v9 = vld [vmem:[#allocation7 + $0x2a0] sm:$0xff]  ;;  %v363_v10 = vld [vmem:[#allocation7 + $0x290] sm:$0xff]  ;;  %v362_v11 = vld [vmem:[#allocation7 + $0x288] sm:$0xff] }
  0x4d   :  { %525 = vmatprep.subr.mxu1 %v414_v38  ;;  %459 = vmatpush1.msra.mxu0 %v302_v39  ;;  %v360_v12 = vld [vmem:[#allocation7 + $0x278] sm:$0xff]  ;;  %v359_v13 = vld [vmem:[#allocation7 + $0x270] sm:$0xff]  ;;  %v357_v14 = vld [vmem:[#allocation7 + $0x260] sm:$0xff] }
  0x4e   :  { %526 = vmatpush1.msra.mxu1 %v413_v40  ;;  %460 = vmatprep.subr.mxu0 %v300_v41  ;;  %v356_v15 = vld [vmem:[#allocation7 + $0x258] sm:$0xff]  ;;  %v354_v16 = vld [vmem:[#allocation7 + $0x248] sm:$0xff]  ;;  %v353_v17 = vld [vmem:[#allocation7 + $0x240] sm:$0xff] }
  0x4f   :  { %527 = vmatprep.subr.mxu1 %v411_v42  ;;  %461 = vmatpush1.msra.mxu0 %v299_v43  ;;  %v351_v18 = vld [vmem:[#allocation7 + $0x230] sm:$0xff]  ;;  %v350_v19 = vld [vmem:[#allocation7 + $0x228] sm:$0xff]  ;;  %v348_v20 = vld [vmem:[#allocation7 + $0x218] sm:$0xff] }
  0x50   :  { %528 = vmatpush1.msra.mxu1 %v410_v44  ;;  %462 = vmatprep.subr.mxu0 %v297_v45  ;;  %v347_v21 = vld [vmem:[#allocation7 + $0x210] sm:$0xff]  ;;  %v345_v22 = vld [vmem:[#allocation7 + $0x200] sm:$0xff]  ;;  %v344_v23 = vld [vmem:[#allocation7 + $0x1f8] sm:$0xff] }
  0x51   :  { %529 = vmatprep.subr.mxu1 %v408_v46  ;;  %463 = vmatpush1.msra.mxu0 %v296_v47  ;;  %v342_v24 = vld [vmem:[#allocation7 + $0x1e8] sm:$0xff]  ;;  %v341_v25 = vld [vmem:[#allocation7 + $0x1e0] sm:$0xff]  ;;  %v339_v26 = vld [vmem:[#allocation7 + $0x1d0] sm:$0xff] }
  0x52   :  { %530 = vmatpush1.msra.mxu1 %v407_v48  ;;  %464 = vmatprep.subr.mxu0 %v294_v49  ;;  %v338_v27 = vld [vmem:[#allocation7 + $0x1c8] sm:$0xff]  ;;  %v396_v28 = vld [vmem:[#allocation7 + $0x398] sm:$0xff]  ;;  %v395_v30 = vld [vmem:[#allocation7 + $0x390] sm:$0xff] }
  0x53   :  { %531 = vmatprep.subr.mxu1 %v405_v50  ;;  %465 = vmatpush1.msra.mxu0 %v293_v51  ;;  %v336_v29 = vld [vmem:[#allocation7 + $0x1b8] sm:$0xff]  ;;  %v335_v31 = vld [vmem:[#allocation7 + $0x1b0] sm:$0xff]  ;;  %v393_v32 = vld [vmem:[#allocation7 + $0x380] sm:$0xff]  ;;  %v101_v50 = vlaneseq }
  0x54   :  { %532 = vmatpush1.msra.mxu1 %v404_v52  ;;  %466 = vmatprep.subr.mxu0 %v291_v53  ;;  %v333_v33 = vld [vmem:[#allocation7 + $0x1a0] sm:$0xff]  ;;  %v392_v34 = vld [vmem:[#allocation7 + $0x378] sm:$0xff]  ;;  %v390_v36 = vld [vmem:[#allocation7 + $0x368] sm:$0xff] }
  0x55   :  { %533 = vmatprep.subr.mxu1 %v402_v54  ;;  %467 = vmatpush1.msra.mxu0 %v290_v55  ;;  %v332_v35 = vld [vmem:[#allocation7 + $0x198] sm:$0xff]  ;;  %v330_v37 = vld [vmem:[#allocation7 + $0x188] sm:$0xff]  ;;  %v389_v38 = vld [vmem:[#allocation7 + $0x360] sm:$0xff]  ;;  %v1402_v51 = vshrl.u32 %v101_v50, 7 }
  0x56   :  { %534 = vmatpush1.msra.mxu1 %v401_v56  ;;  %468 = vmatprep.subr.mxu0 %v288_v57  ;;  %v329_v39 = vld [vmem:[#allocation7 + $0x180] sm:$0xff]  ;;  %v387_v40 = vld [vmem:[#allocation7 + $0x350] sm:$0xff]  ;;  %v386_v41 = vld [vmem:[#allocation7 + $0x348] sm:$0xff] }
  0x57   :  { %535 = vmatprep.subr.mxu1 %v399_v58  ;;  %469 = vmatpush1.msra.mxu0 %v287_v59  ;;  %v424_v42 = vld [vmem:[#allocation7 + $0x478] sm:$0xff]  ;;  %v383_v44 = vld [vmem:[#allocation7 + $0x330] sm:$0xff]  ;;  %v381_v45 = vld [vmem:[#allocation7 + $0x320] sm:$0xff]  ;;  %v103_v52 = vsub.s32 0, %v1402_v51  ;;  %v107_v54 = vsub.s32 1, %v1402_v51 }
  0x58   :  { %536 = vmatpush1.msra.mxu1 %v398_v60  ;;  %470 = vmatprep.subr.mxu0 %v285_v61  ;;  %v384_v43 = vld [vmem:[#allocation7 + $0x338] sm:$0xff]  ;;  %v378_v47 = vld [vmem:[#allocation7 + $0x308] sm:$0xff]  ;;  %v377_v48 = vld [vmem:[#allocation7 + $0x300] sm:$0xff] }
  0x59   :  { %471 = vmatpush1.msra.mxu0 %v284_v62  ;;  %537 = vmatprep.subr.mxu1 %v396_v28  ;;  %v380_v46 = vld [vmem:[#allocation7 + $0x318] sm:$0xff]  ;;  %v99_v53 = vld [vmem:[%s1468_s2] sm:$0x7] }
  0x5a   :  { %472 = vmatprep.subr.mxu0 %v282_v63  ;;  %538 = vmatpush1.msra.mxu1 %v395_v30  ;;  %v376_v49 = vld [vmem:[#allocation7 + $0x2f8] sm:$0xff]  ;;  %v104_v55 = vrot.slane %v99_v53, %v103_v52  ;;  %v108_v56 = vrot.slane %v99_v53, %v107_v54  ;;  %v111_v63 = vsub.s32 2, %v1402_v51  ;;  %v379_v50 = vld [vmem:[#allocation7 + $0x310] sm:$0xff] }
  0x5b   :  { %473 = vmatpush1.msra.mxu0 %v281_v1  ;;  %539 = vmatprep.subr.mxu1 %v393_v32  ;;  %v364_v28 = vld [vmem:[#allocation7 + $0x298] sm:$0xff]  ;;  %v397_v32 = vld [vmem:[#allocation7 + $0x3a0] sm:$0xff] }
  0x5c   :  { %474 = vmatprep.subr.mxu0 %v375_v2  ;;  %540 = vmatpush1.msra.mxu1 %v392_v34  ;;  %v400_v30 = vld [vmem:[#allocation7 + $0x3b8] sm:$0xff]  ;;  %v310_v34 = vld [vmem:[#allocation7 + $0xe8] sm:$0xff] }
  0x5d   :  { %475 = vmatpush2.msra.mxu0 %v374_v3  ;;  %541 = vmatprep.subr.mxu1 %v390_v36  ;;  %v355_v36 = vld [vmem:[#allocation7 + $0x250] sm:$0xff] }
  0x5e   :  { %476 = vmatprep.subr.mxu0 %v372_v4  ;;  %542 = vmatpush1.msra.mxu1 %v389_v38  ;;  %v391_v38 = vld [vmem:[#allocation7 + $0x370] sm:$0xff] }
  0x5f   :  { %477 = vmatpush2.msra.mxu0 %v371_v5  ;;  %543 = vmatprep.subr.mxu1 %v387_v40  ;;  %v421_v5 = vld [vmem:[#allocation7 + $0x460] sm:$0xff]  ;;  %v304_v40 = vld [vmem:[#allocation7 + $0xb8] sm:$0xff] }
  0x60   :  { %478 = vmatprep.subr.mxu0 %v369_v6  ;;  %544 = vmatpush1.msra.mxu1 %v386_v41  ;;  %v388_v41 = vld [vmem:[#allocation7 + $0x358] sm:$0xff] }
  0x61   :  { %479 = vmatpush2.msra.mxu0 %v368_v7  ;;  %545 = vmatprep.subr.mxu1 %v384_v43  ;;  %v301_v43 = vld [vmem:[#allocation7 + $0xa0] sm:$0xff] }
  0x62   :  { %480 = vmatprep.subr.mxu0 %v366_v8  ;;  %546 = vmatpush1.msra.mxu1 %v383_v44  ;;  %v112_v8 = vrot.slane %v99_v53, %v111_v63  ;;  %v385_v44 = vld [vmem:[#allocation7 + $0x340] sm:$0xff]  ;;  %v340_v53 = vld [vmem:[#allocation7 + $0x1d8] sm:$0xff] }
  0x63   :  { %481 = vmatpush2.msra.mxu0 %v365_v9  ;;  %547 = vmatprep.subr.mxu1 %v381_v45  ;;  %v418_v9 = vld [vmem:[#allocation7 + $0x448] sm:$0xff] }
  0x64   :  { %482 = vmatprep.subr.mxu0 %v363_v10  ;;  %548 = vmatpush1.msra.mxu1 %v380_v46  ;;  %v346_v45 = vld [vmem:[#allocation7 + $0x208] sm:$0xff] }
  0x65   :  { %483 = vmatpush2.msra.mxu0 %v362_v11  ;;  %549 = vmatprep.subr.mxu1 %v378_v47  ;;  %v298_v46 = vld [vmem:[#allocation7 + $0x88] sm:$0xff] }
  0x66   :  { %484 = vmatprep.subr.mxu0 %v360_v12  ;;  %550 = vmatpush1.msra.mxu1 %v377_v48  ;;  %v382_v47 = vld [vmem:[#allocation7 + $0x328] sm:$0xff]  ;;  %v343_v48 = vld [vmem:[#allocation7 + $0x1f0] sm:$0xff] }
  0x67   :  { %485 = vmatpush2.msra.mxu0 %v359_v13  ;;  %1001 = vmatprep.subr.mxu1 %v376_v49  ;;  %v415_v13 = vld [vmem:[#allocation7 + $0x430] sm:$0xff] }
  0x68   :  { %486 = vmatprep.subr.mxu0 %v357_v14  ;;  %v295_v49 = vld [vmem:[#allocation7 + $0x70] sm:$0xff] }
  0x69   :  { %487 = vmatpush2.msra.mxu0 %v356_v15  ;;  %v328_v15 = vld [vmem:[#allocation7 + $0x178] sm:$0xff] }
  0x6a   :  { %488 = vmatprep.subr.mxu0 %v354_v16  ;;  %v412_v16 = vld [vmem:[#allocation7 + $0x418] sm:$0xff] }
  0x6b   :  { %489 = vmatpush2.msra.mxu0 %v353_v17  ;;  %v373_v17 = vld [vmem:[#allocation7 + $0x2e0] sm:$0xff] }
  0x6c   :  { %490 = vmatprep.subr.mxu0 %v351_v18 }
  0x6d   :  { %491 = vmatpush2.msra.mxu0 %v350_v19  ;;  %v325_v19 = vld [vmem:[#allocation7 + $0x160] sm:$0xff] }
  0x6e   :  { %492 = vmatprep.subr.mxu0 %v348_v20  ;;  %v409_v20 = vld [vmem:[#allocation7 + $0x400] sm:$0xff] }
  0x6f   :  { %493 = vmatpush2.msra.mxu0 %v347_v21  ;;  %v370_v21 = vld [vmem:[#allocation7 + $0x2c8] sm:$0xff] }
  0x70   :  { %494 = vmatprep.subr.mxu0 %v345_v22  ;;  %v406_v22 = vld [vmem:[#allocation7 + $0x3e8] sm:$0xff] }
  0x71   :  { %495 = vmatpush2.msra.mxu0 %v344_v23 }
  0x72   :  { %496 = vmatprep.subr.mxu0 %v342_v24  ;;  %v322_v24 = vld [vmem:[#allocation7 + $0x148] sm:$0xff] }
  0x73   :  { %497 = vmatpush2.msra.mxu0 %v341_v25  ;;  %v367_v25 = vld [vmem:[#allocation7 + $0x2b0] sm:$0xff] }
  0x74   :  { %498 = vmatprep.subr.mxu0 %v339_v26  ;;  %v319_v26 = vld [vmem:[#allocation7 + $0x130] sm:$0xff] }
  0x75   :  { %499 = vmatpush2.msra.mxu0 %v338_v27  ;;  %v403_v27 = vld [vmem:[#allocation7 + $0x3d0] sm:$0xff] }
  0x76   :  { %500 = vmatprep.subr.mxu0 %v336_v29  ;;  %v316_v29 = vld [vmem:[#allocation7 + $0x118] sm:$0xff] }
  0x77   :  { %501 = vmatpush2.msra.mxu0 %v335_v31  ;;  %v313_v31 = vld [vmem:[#allocation7 + $0x100] sm:$0xff] }
  0x78   :  { %502 = vmatprep.subr.mxu0 %v333_v33  ;;  %v358_v33 = vld [vmem:[#allocation7 + $0x268] sm:$0xff] }
  0x79   :  { %503 = vmatpush2.msra.mxu0 %v332_v35  ;;  %v394_v35 = vld [vmem:[#allocation7 + $0x388] sm:$0xff] }
  0x7a   :  { %504 = vmatprep.subr.mxu0 %v330_v37  ;;  %v307_v37 = vld [vmem:[#allocation7 + $0xd0] sm:$0xff] }
  0x7b   :  { %505 = vmatpush2.msra.mxu0 %v329_v39  ;;  %v352_v39 = vld [vmem:[#allocation7 + $0x238] sm:$0xff] }
  0x7c   :  { %1124 = vmatprep.subr.mxu0 %v424_v42 }
  0xfd   :  { %v189_v57 = vpop.f32.mrf.mxu1 }
  0xfe   :  { %v1413_v58 = vadd.f32 %v189_v57, %v104_v55  ;;  %v289_v57 = vld [vmem:[#allocation7 + $0x40] sm:$0xff] }
  0xff   :  { %v191_v59 = vpop.f32.mrf.mxu1 }
 0x100   :  { %v192_v60 = vadd.f32 %v191_v59, %v108_v56  ;;  %v275_v1 = vmax.f32 %v1413_v58, 0.0  ;;  %v334_v59 = vld [vmem:[#allocation7 + $0x1a8] sm:$0xff]  ;;  %v763_v58 = vld [vmem:[#allocation8 + $0x58] sm:$0xff] }
 0x101   :  { %v195_v61 = vpop.f32.mrf.mxu1 }
 0x102   :  { %v276_v62 = vmax.f32 %v192_v60, 0.0  ;;  %v1417_v2 = vadd.f32 %v195_v61, %v104_v55  ;;  %v292_v55 = vld [vmem:[#allocation7 + $0x58] sm:$0xff]  ;;  %v286_v60 = vld [vmem:[#allocation7 + $0x28] sm:$0xff]  ;;  %v331_v61 = vld [vmem:[#allocation7 + $0x190] sm:$0xff] }
 0x103   :  { %v197_v3 = vpop.f32.mrf.mxu1 }
 0x104   :  { %v1419_v4 = vadd.f32 %v197_v3, %v108_v56  ;;  %506 = vmatprep.mubr.f32.mxu0 %v276_v62  ;;  %v278_v10 = vmax.f32 %v1417_v2, 0.0  ;;  %v337_v56 = vld [vmem:[#allocation7 + $0x1c0] sm:$0xff]  ;;  %v783_v3 = vld [vmem:[#allocation8 + $0xf8] sm:$0xff] }
 0x105   :  { %v1123_v6 = vpop.f32.mrf.mxu1  ;;  %507 = vmatmul.mubr.f32.vlgmr.msra.gmra.mxu0 %v275_v1  ;;  %v775_v2 = vld [vmem:[#allocation8 + $0xb8] sm:$0xff] }
 0x106   :  { %v279_v7 = vmax.f32 %v1419_v4, 0.0  ;;  %1125 = vmatpush3.msra.mxu0 %v424_v42  ;;  %v1431_v18 = vadd.f32 %v1123_v6, %v112_v8  ;;  %v349_v42 = vld [vmem:[#allocation7 + $0x220] sm:$0xff]  ;;  %v782_v6 = vld [vmem:[#allocation8 + $0xf0] sm:$0xff] }
 0x107   :  { %1126 = vmatprep.subr.mxu0 %v421_v5  ;;  %v266_v11 = vpop.f32.mrf.mxu1  ;;  %v762_v4 = vld [vmem:[#allocation8 + $0x50] sm:$0xff] }
 0x108   :  { %v267_v12 = vadd.f32 %v266_v11, %v112_v8  ;;  %1127 = vmatpush3.msra.mxu0 %v421_v5  ;;  %512 = vmatprep.mubr.f32.mxu0 %v279_v7  ;;  %v280_v23 = vmax.f32 %v1431_v18, 0.0  ;;  %v767_v5 = vld [vmem:[#allocation8 + $0x78] sm:$0xff]  ;;  %v766_v8 = vld [vmem:[#allocation8 + $0x70] sm:$0xff]  ;;  %v765_v11 = vld [vmem:[#allocation8 + $0x68] sm:$0xff] }
 0x109   :  { %1128 = vmatprep.subr.mxu0 %v418_v9  ;;  %513 = vmatmul.mubr.f32.gmra.mxu0 %v278_v10  ;;  %v774_v18 = vld [vmem:[#allocation8 + $0xb0] sm:$0xff] }
 0x10a   :  { %v277_v14 = vmax.f32 %v267_v12, 0.0  ;;  %1129 = vmatpush3.msra.mxu0 %v418_v9  ;;  %v781_v9 = vld [vmem:[#allocation8 + $0xe8] sm:$0xff]  ;;  %v780_v12 = vld [vmem:[#allocation8 + $0xe0] sm:$0xff] }
 0x10b   :  { %1130 = vmatprep.subr.mxu0 %v415_v13 }
 0x10c   :  { %1131 = vmatpush3.msra.mxu0 %v415_v13  ;;  %584 = vmatmul.mubr.f32.vlgmr.msra.gmra.mxu1 %v277_v14  ;;  %v764_v13 = vld [vmem:[#allocation8 + $0x60] sm:$0xff] }
 0x10d   :  { %1002 = vmatpush3.msra.mxu1 %v328_v15  ;;  %1132 = vmatprep.subr.mxu0 %v412_v16  ;;  %v761_v15 = vld [vmem:[#allocation8 + $0x48] sm:$0xff] }
 0x10e   :  { %1156 = vmatprep.mubr.f32.mxu0 %v277_v14  ;;  %1003 = vmatprep.subr.mxu1 %v373_v17  ;;  %v779_v14 = vld [vmem:[#allocation8 + $0xd8] sm:$0xff]  ;;  %v760_v17 = vld [vmem:[#allocation8 + $0x40] sm:$0xff] }
 0x10f   :  { %1133 = vmatpush3.msra.mxu0 %v412_v16  ;;  %1004 = vmatpush3.msra.mxu1 %v325_v19  ;;  %v776_v16 = vld [vmem:[#allocation8 + $0xc0] sm:$0xff]  ;;  %v758_v19 = vld [vmem:[#allocation8 + $0x30] sm:$0xff] }
 0x110   :  { %1134 = vmatprep.subr.mxu0 %v409_v20  ;;  %589 = vmatprep.mubr.f32.mxu1 %v1324_v0  ;;  %v361_v0 = vld [vmem:[#allocation7 + $0x280] sm:$0xff] }
 0x111   :  { %1005 = vmatprep.subr.mxu1 %v370_v21  ;;  %1135 = vmatpush3.msra.mxu0 %v409_v20  ;;  %v773_v20 = vld [vmem:[#allocation8 + $0xa8] sm:$0xff] }
 0x112   :  { %590 = vmatmul.mubr.f32.gmra.mxu1 %v280_v23  ;;  %1136 = vmatprep.subr.mxu0 %v406_v22  ;;  %v757_v21 = vld [vmem:[#allocation8 + $0x28] sm:$0xff] }
 0x113   :  { %1006 = vmatpush3.msra.mxu1 %v322_v24  ;;  %660 = vmatprep.mubr.f32.mxu1 %v276_v62  ;;  %v283_v62 = vld [vmem:[#allocation7 + $0x10] sm:$0xff]  ;;  %v771_v24 = vld [vmem:[#allocation8 + $0x98] sm:$0xff] }
 0x114   :  { %1007 = vmatprep.subr.mxu1 %v367_v25  ;;  %1137 = vmatpush3.msra.mxu0 %v406_v22  ;;  %v772_v22 = vld [vmem:[#allocation8 + $0xa0] sm:$0xff]  ;;  %v755_v25 = vld [vmem:[#allocation8 + $0x18] sm:$0xff] }
 0x115   :  { %1008 = vmatpush3.msra.mxu1 %v319_v26  ;;  %1138 = vmatprep.subr.mxu0 %v403_v27  ;;  %v770_v26 = vld [vmem:[#allocation8 + $0x90] sm:$0xff] }
 0x116   :  { %1009 = vmatprep.subr.mxu1 %v364_v28  ;;  %1139 = vmatpush3.msra.mxu0 %v403_v27  ;;  %v754_v27 = vld [vmem:[#allocation8 + $0x10] sm:$0xff]  ;;  %v769_v28 = vld [vmem:[#allocation8 + $0x88] sm:$0xff] }
 0x117   :  { %1010 = vmatpush3.msra.mxu1 %v316_v29  ;;  %1140 = vmatprep.subr.mxu0 %v400_v30  ;;  %v753_v29 = vld [vmem:[#allocation8 + $0x8] sm:$0xff] }
 0x118   :  { %1011 = vmatprep.subr.mxu1 %v361_v0  ;;  %1141 = vmatpush3.msra.mxu0 %v400_v30  ;;  %v768_v30 = vld [vmem:[#allocation8 + $0x80] sm:$0xff] }
 0x119   :  { %1012 = vmatpush3.msra.mxu1 %v313_v31  ;;  %1142 = vmatprep.subr.mxu0 %v397_v32  ;;  %v752_v0 = vld [vmem:[#allocation8] sm:$0xff]  ;;  %v799_v31 = vld [vmem:[#allocation8 + $0x178] sm:$0xff] }
 0x11a   :  { %1013 = vmatprep.subr.mxu1 %v358_v33  ;;  %1143 = vmatpush3.msra.mxu0 %v397_v32  ;;  %v798_v32 = vld [vmem:[#allocation8 + $0x170] sm:$0xff]  ;;  %v797_v33 = vld [vmem:[#allocation8 + $0x168] sm:$0xff] }
 0x11b   :  { %1014 = vmatpush3.msra.mxu1 %v310_v34  ;;  %1144 = vmatprep.subr.mxu0 %v394_v35  ;;  %v796_v34 = vld [vmem:[#allocation8 + $0x160] sm:$0xff] }
 0x11c   :  { %1015 = vmatprep.subr.mxu1 %v355_v36  ;;  %1145 = vmatpush3.msra.mxu0 %v394_v35  ;;  %v795_v35 = vld [vmem:[#allocation8 + $0x158] sm:$0xff]  ;;  %v794_v36 = vld [vmem:[#allocation8 + $0x150] sm:$0xff] }
 0x11d   :  { %1016 = vmatpush3.msra.mxu1 %v307_v37  ;;  %1146 = vmatprep.subr.mxu0 %v391_v38  ;;  %v793_v37 = vld [vmem:[#allocation8 + $0x148] sm:$0xff] }
 0x11e   :  { %1017 = vmatprep.subr.mxu1 %v352_v39  ;;  %1147 = vmatpush3.msra.mxu0 %v391_v38  ;;  %v792_v38 = vld [vmem:[#allocation8 + $0x140] sm:$0xff]  ;;  %v791_v39 = vld [vmem:[#allocation8 + $0x138] sm:$0xff] }
 0x11f   :  { %1018 = vmatpush3.msra.mxu1 %v304_v40  ;;  %1148 = vmatprep.subr.mxu0 %v388_v41  ;;  %v790_v40 = vld [vmem:[#allocation8 + $0x130] sm:$0xff] }
 0x120   :  { %1019 = vmatprep.subr.mxu1 %v349_v42  ;;  %1149 = vmatpush3.msra.mxu0 %v388_v41  ;;  %v789_v41 = vld [vmem:[#allocation8 + $0x128] sm:$0xff]  ;;  %v788_v42 = vld [vmem:[#allocation8 + $0x120] sm:$0xff] }
 0x121   :  { %1020 = vmatpush3.msra.mxu1 %v301_v43  ;;  %1150 = vmatprep.subr.mxu0 %v385_v44  ;;  %v787_v43 = vld [vmem:[#allocation8 + $0x118] sm:$0xff] }
 0x122   :  { %1021 = vmatprep.subr.mxu1 %v346_v45  ;;  %1151 = vmatpush3.msra.mxu0 %v385_v44  ;;  %v786_v44 = vld [vmem:[#allocation8 + $0x110] sm:$0xff]  ;;  %v785_v45 = vld [vmem:[#allocation8 + $0x108] sm:$0xff] }
 0x123   :  { %1022 = vmatpush3.msra.mxu1 %v298_v46  ;;  %1152 = vmatprep.subr.mxu0 %v382_v47  ;;  %v784_v46 = vld [vmem:[#allocation8 + $0x100] sm:$0xff] }
 0x124   :  { %1023 = vmatprep.subr.mxu1 %v343_v48  ;;  %1153 = vmatpush3.msra.mxu0 %v382_v47  ;;  %v425_v47 = vld [vmem:[%s1470_s4] sm:$0x7] }
 0x125   :  { %1024 = vmatpush3.msra.mxu1 %v295_v49  ;;  %1154 = vmatprep.subr.mxu0 %v379_v50  ;;  %v430_v49 = vrot.slane %v425_v47, %v103_v52 }
 0x126   :  { %1025 = vmatprep.subr.mxu1 %v340_v53  ;;  %1155 = vmatpush3.msra.mxu0 %v379_v50  ;;  %v434_v53 = vrot.slane %v425_v47, %v107_v54 }
 0x127   :  { %1026 = vmatpush3.msra.mxu1 %v292_v55  ;;  %1157 = vmatmul.mubr.f32.vlgmr.msra.gmra.mxu0 %v280_v23  ;;  %v756_v23 = vld [vmem:[#allocation8 + $0x20] sm:$0xff] }
 0x128   :  { %1027 = vmatprep.subr.mxu1 %v337_v56  ;;  %1159 = vmatprep.subr.mxu0 %v799_v31 }
 0x129   :  { %1028 = vmatpush3.msra.mxu1 %v289_v57  ;;  %1160 = vmatpush3.msra.mxu0 %v799_v31 }
 0x12a   :  { %1029 = vmatprep.subr.mxu1 %v334_v59  ;;  %1161 = vmatprep.subr.mxu0 %v798_v32 }
 0x12b   :  { %1030 = vmatpush3.msra.mxu1 %v286_v60  ;;  %1162 = vmatpush3.msra.mxu0 %v798_v32 }
 0x12c   :  { %1031 = vmatprep.subr.mxu1 %v331_v61  ;;  %1163 = vmatprep.subr.mxu0 %v797_v33 }
 0x12d   :  { %1032 = vmatpush3.msra.mxu1 %v283_v62  ;;  %1164 = vmatpush3.msra.mxu0 %v797_v33 }
 0x12e   :  { %661 = vmatmul.mubr.f32.vlgmr.msra.gmra.mxu1 %v275_v1  ;;  %1057 = vmatprep.subr.mxu1 %v783_v3  ;;  %v778_v1 = vld [vmem:[#allocation8 + $0xd0] sm:$0xff] }
 0x12f   :  { %665 = vmatprep.mubr.f32.mxu1 %v279_v7  ;;  %1058 = vmatpush3.msra.mxu1 %v767_v5  ;;  %v777_v7 = vld [vmem:[#allocation8 + $0xc8] sm:$0xff] }
 0x130   :  { %1059 = vmatprep.subr.mxu1 %v782_v6  ;;  %1165 = vmatprep.subr.mxu0 %v796_v34 }
 0x131   :  { %1060 = vmatpush3.msra.mxu1 %v766_v8  ;;  %1166 = vmatpush3.msra.mxu0 %v796_v34  ;;  %v994_v34 = vld [vmem:[%s1473_s7] ss:$0 sm:$0xff] }
 0x132   :  { %666 = vmatmul.mubr.f32.gmra.mxu1 %v278_v10  ;;  %1061 = vmatprep.subr.mxu1 %v781_v9  ;;  %v759_v10 = vld [vmem:[#allocation8 + $0x38] sm:$0xff] }
 0x133   :  { %1062 = vmatpush3.msra.mxu1 %v765_v11  ;;  %1167 = vmatprep.subr.mxu0 %v795_v35 }
 0x134   :  { %1063 = vmatprep.subr.mxu1 %v780_v12  ;;  %1168 = vmatpush3.msra.mxu0 %v795_v35 }
 0x135   :  { %1064 = vmatpush3.msra.mxu1 %v764_v13  ;;  %1169 = vmatprep.subr.mxu0 %v794_v36 }
 0x136   :  { %1065 = vmatprep.subr.mxu1 %v779_v14  ;;  %1170 = vmatpush3.msra.mxu0 %v794_v36 }
 0x137   :  { %1066 = vmatpush3.msra.mxu1 %v763_v58  ;;  %1171 = vmatprep.subr.mxu0 %v793_v37 }
 0x138   :  { %1067 = vmatprep.subr.mxu1 %v778_v1  ;;  %1172 = vmatpush3.msra.mxu0 %v793_v37  ;;  %v438_v1 = vrot.slane %v425_v47, %v111_v63 }
 0x139   :  { %1068 = vmatpush3.msra.mxu1 %v762_v4  ;;  %1173 = vmatprep.subr.mxu0 %v792_v38 }
 0x13a   :  { %1069 = vmatprep.subr.mxu1 %v777_v7  ;;  %1174 = vmatpush3.msra.mxu0 %v792_v38 }
 0x13b   :  { %1070 = vmatpush3.msra.mxu1 %v761_v15  ;;  %1175 = vmatprep.subr.mxu0 %v791_v39 }
 0x13c   :  { %1071 = vmatprep.subr.mxu1 %v776_v16  ;;  %1176 = vmatpush3.msra.mxu0 %v791_v39 }
 0x13d   :  { %1072 = vmatpush3.msra.mxu1 %v760_v17  ;;  %1177 = vmatprep.subr.mxu0 %v790_v40 }
 0x13e   :  { %1073 = vmatprep.subr.mxu1 %v775_v2  ;;  %1178 = vmatpush3.msra.mxu0 %v790_v40 }
 0x13f   :  { %1074 = vmatpush3.msra.mxu1 %v759_v10  ;;  %1179 = vmatprep.subr.mxu0 %v789_v41 }
 0x140   :  { %1075 = vmatprep.subr.mxu1 %v774_v18  ;;  %1180 = vmatpush3.msra.mxu0 %v789_v41 }
 0x141   :  { %1076 = vmatpush3.msra.mxu1 %v758_v19  ;;  %1181 = vmatprep.subr.mxu0 %v788_v42 }
 0x142   :  { %1077 = vmatprep.subr.mxu1 %v773_v20  ;;  %1182 = vmatpush3.msra.mxu0 %v788_v42 }
 0x143   :  { %1078 = vmatpush3.msra.mxu1 %v757_v21  ;;  %1183 = vmatprep.subr.mxu0 %v787_v43 }
 0x144   :  { %1079 = vmatprep.subr.mxu1 %v772_v22  ;;  %1184 = vmatpush3.msra.mxu0 %v787_v43 }
 0x145   :  { %1080 = vmatpush3.msra.mxu1 %v756_v23  ;;  %1185 = vmatprep.subr.mxu0 %v786_v44 }
 0x146   :  { %1081 = vmatprep.subr.mxu1 %v771_v24  ;;  %1186 = vmatpush3.msra.mxu0 %v786_v44 }
 0x147   :  { %1082 = vmatpush3.msra.mxu1 %v755_v25  ;;  %1187 = vmatprep.subr.mxu0 %v785_v45 }
 0x148   :  { %1083 = vmatprep.subr.mxu1 %v770_v26  ;;  %1188 = vmatpush3.msra.mxu0 %v785_v45 }
 0x149   :  { %1084 = vmatpush3.msra.mxu1 %v754_v27  ;;  %1189 = vmatprep.subr.mxu0 %v784_v46 }
 0x14a   :  { %1085 = vmatprep.subr.mxu1 %v769_v28  ;;  %1190 = vmatpush3.msra.mxu0 %v784_v46  ;;  %v993_v28 = vld [vmem:[%s1472_s6] ss:$0 sm:$0xff]  ;;  %s1288_s6 = scalar_lea.vmem %s976_s10, 256 }
 0x14b   :  { %1086 = vmatpush3.msra.mxu1 %v753_v29  ;;  %p1289_p6 = scmp.ne.s32.totalorder %s976_s10, %s1288_s6  ;;  %p1294_p8 = scmp.lt.s32.totalorder %s1288_s6, %s1288_s6 }
 0x14c   :  { %1087 = vmatprep.subr.mxu1 %v768_v30 }
 0x14d   :  { %1088 = vmatpush3.msra.mxu1 %v752_v0  ;;  %p1295_p9 = por %p1294_p8, %p1293_p7 }
 0x14f   :  { %p1296_p10 = pnand %p1295_p9, %p1289_p6 }
 0x1c5   :  { %v508_v48 = vpop.f32.mrf.mxu0 }
 0x1c6   :  { %v509_v55 = vadd.f32 %v508_v48, %v430_v49 }
 0x1c7   :  { %v510_v50 = vpop.f32.mrf.mxu0 }
 0x1c8   :  { %v511_v59 = vadd.f32 %v510_v50, %v434_v53 }
 0x1c9   :  { %v514_v56 = vpop.f32.mrf.mxu0 }
 0x1ca   :  { %v515_v6 = vadd.f32 %v514_v56, %v430_v49 }
 0x1cb   :  { %v516_v3 = vpop.f32.mrf.mxu0 }
 0x1cc   :  { %v585_v57 = vpop.f32.mrf.mxu1  ;;  %v517_v11 = vadd.f32 %v516_v3, %v434_v53 }
 0x1cd   :  { %v586_v60 = vadd.f32 %v585_v57, %v509_v55 }
 0x1ce   :  { %v587_v61 = vpop.f32.mrf.mxu1 }
 0x1cf   :  { %v588_v62 = vadd.f32 %v587_v61, %v511_v59  ;;  %v746_v8 = vmax.f32 %v586_v60, 0.0 }
 0x1d1   :  { %v747_v5 = vmax.f32 %v588_v62, 0.0 }
 0x1d2   :  { %v591_v9 = vpop.f32.mrf.mxu1 }
 0x1d3   :  { %871 = vmatprep.mubr.f32.mxu1 %v747_v5  ;;  %v592_v12 = vadd.f32 %v591_v9, %v515_v6 }
 0x1d4   :  { %v593_v52 = vpop.f32.mrf.mxu1  ;;  %872 = vmatmul.mubr.f32.vlgmr.msra.gmra.mxu1 %v746_v8 }
 0x1d5   :  { %v594_v13 = vadd.f32 %v593_v52, %v517_v11  ;;  %v749_v54 = vmax.f32 %v592_v12, 0.0 }
 0x1d7   :  { %v750_v14 = vmax.f32 %v594_v13, 0.0 }
 0x1d9   :  { %876 = vmatprep.mubr.f32.mxu1 %v750_v14 }
 0x1da   :  { %877 = vmatmul.mubr.f32.gmra.mxu1 %v749_v54 }
 0x1e7   :  { %v1158_v4 = vpop.f32.mrf.mxu0 }
 0x1e9   :  { %v737_v2 = vpop.f32.mrf.mxu0 }
 0x1ee   :  { %v1033_v58 = vpop.f32.mrf.mxu1 }
 0x1f0   :  { %v1034_v7 = vpop.f32.mrf.mxu1 }
 0x1f1   :  { %v1035_v15 = vadd.f32 %v1034_v7, %v1033_v58 }
 0x1f2   :  { %v1036_v16 = vpop.f32.mrf.mxu1 }
 0x1f3   :  { %v663_v17 = vadd.f32 %v1035_v15, %v438_v1 }
 0x1f4   :  { %v1037_v10 = vpop.f32.mrf.mxu1 }
 0x1f5   :  { %v1038_v18 = vadd.f32 %v1037_v10, %v1036_v16  ;;  %v738_v19 = vadd.f32 %v737_v2, %v663_v17 }
 0x1f7   :  { %v668_v20 = vadd.f32 %v1038_v18, %v438_v1  ;;  %v748_v21 = vmax.f32 %v738_v19, 0.0 }
 0x1f9   :  { %v743_v22 = vadd.f32 %v1158_v4, %v668_v20  ;;  %1191 = vmatprep.mubr.f32.mxu0 %v748_v21 }
 0x1fb   :  { %v751_v23 = vmax.f32 %v743_v22, 0.0 }
 0x1fd   :  { %1192 = vmatmul.mubr.f32.vlgmr.msra.gmra.mxu0 %v751_v23 }
 0x294   :  { %v1089_v24 = vpop.f32.mrf.mxu1 }
 0x296   :  { %v1090_v25 = vpop.f32.mrf.mxu1 }
 0x297   :  { %v1091_v27 = vadd.f32 %v1090_v25, %v1089_v24 }
 0x299   :  { %v874_v31 = vadd.f32 %v1091_v27, %v993_v28 }
 0x29a   :  { %v1092_v26 = vpop.f32.mrf.mxu1 }
 0x29c   :  { %v1093_v51 = vpop.f32.mrf.mxu1 }
 0x29d   :  { %v1094_v63 = vadd.f32 %v1093_v51, %v1092_v26 }
 0x29f   :  { %v879_v29 = vadd.f32 %v1094_v63, %v993_v28 }
 0x2bd   :  { %v1193_v30 = vpop.f32.mrf.mxu0 }
 0x2be   :  { %v954_v0 = vadd.f32 %v1193_v30, %v879_v29 }
 0x2bf   :  { %v948_v32 = vpop.f32.mrf.mxu0 }
 0x2c0   :  { %1204 = vtanh.f32 %v954_v0  ;;  %v949_v33 = vadd.f32 %v948_v32, %v874_v31 }
 0x2c2   :  { %1206 = vtanh.f32 %v949_v33 }
 0x2cd   :  { %v1205_v35 = vpop.eup %1204 }
 0x2ce   :  { %v967_v36 = vmul.f32 %v1205_v35, %v994_v34 }
 0x2cf   :  { %v1207_v37 = vpop.eup %1206 }
 0x2d0   :  { %v966_v38 = vmul.f32 %v1207_v37, %v994_v34  ;;  %969 = vst [vmem:[#allocation10 + $0x8] sm:$0xff] %v967_v36 }
 0x2d2   :  { %968 = vst [vmem:[#allocation10] sm:$0xff] %v966_v38 }
 0x2d3   :  { %1299 = shalt.err (!%p1296_p10)
}
 0x2d4   :  { %981 = dma.vmem_to_hbm [thread:$0]  %s976_s10, 256, %s1474_s8, [#allocation4], %s1320_s15, %s1320_s15, %s1321_s16  }
 0x2d5   :  { %1314 = dma.done.wait [#allocation4], 256  }
 0x2d6   :  { %1315 = vsyncadd [#allocation4], 4294967040 }
 0x2d7   :  { %985 = vsyncpa [#allocation3], 1 }
 0x2d8   :  { %986 = vsyncpa [#allocation6], 1 }
 0x2d9   :  { %987 = vsyncpa [#allocation9], 1 }
 0x2da   :  { %988 = vsyncpa [#allocation4], 1 }

</bundles_post_ra>
